<compile_context>
chip_gen: v7x
topology: tpu7x:2x2x1
jax: 0.10.0
libtpu: 0.0.40
codegen_flags: <defaults>
</compile_context>

<pallas_src>
import functools

import jax
import jax.numpy as jnp
from jax.experimental import pallas as pl
from jax.experimental.pallas import tpu as pltpu


def _presup_kernel(x_ref, w_ref, out_ref):
    # pre_sup[s, row_tile, :] = x[row_tile, :] @ W[s]
    out_ref[...] = jnp.dot(
        x_ref[...], w_ref[...], preferred_element_type=jnp.float32
    ).astype(out_ref.dtype)


def _aggregate_kernel(sup_ref, pre_ref, out_ref, *, apply_relu):
    s = pl.program_id(1)

    @pl.when(s == 0)
    def _():
        out_ref[...] = jnp.zeros_like(out_ref)

    # out[row_tile, :] += support[s][row_tile, :] @ pre_sup[s]
    out_ref[...] += jnp.dot(
        sup_ref[...], pre_ref[...], preferred_element_type=jnp.float32
    )

    if apply_relu:
        @pl.when(s == pl.num_programs(1) - 1)
        def _():
            out_ref[...] = jnp.maximum(out_ref[...], 0.0)


def _row_tile(n):
    """Largest MXU-friendly row tile (<=256) that divides N exactly."""
    for cand in (256, 128, 64, 32, 16, 8):
        if n % cand == 0:
            return cand
    return n  # ragged small N: single full-row block


def _compute_presup(x, weights, tm):
    """pre_sup[s] = x @ W[s]  ->  (S, N, F) f32."""
    n, d = x.shape
    s_num, _, f = weights.shape
    rows = n // tm
    return pl.pallas_call(
        _presup_kernel,
        out_shape=jax.ShapeDtypeStruct((s_num, n, f), jnp.float32),
        grid_spec=pltpu.PrefetchScalarGridSpec(
            num_scalar_prefetch=0,
            grid=(s_num, rows),
            in_specs=[
                pl.BlockSpec((tm, d), lambda s, i: (i, 0)),                 # x rows
                pl.BlockSpec((pl.Squeezed(), d, f), lambda s, i: (s, 0, 0)),  # W[s]
            ],
            out_specs=pl.BlockSpec((pl.Squeezed(), tm, f),
                                   lambda s, i: (s, i, 0)),
        ),
        compiler_params=pltpu.CompilerParams(
            dimension_semantics=("parallel", "parallel"),
        ),
    )(x, weights)


def graph_convolution(x, supports, weights, *, apply_relu=False,
                      featureless=False):
    """GCN layer forward.

    x:        (N, D) f32 node features (ignored if featureless=True)
    supports: (S, N, N) f32 adjacency / support matrices
    weights:  (S, D, F) f32 (featureless=False)  or  (S, N, F) (featureless=True)
    returns:  (N, F) f32
    """
    # TODO(synk): dropout_rate > 0 not implemented (default 0.0 is identity);
    #             only ReLU supported as act_func; bias is unused in the
    #             reference forward.
    s_num, n, _ = supports.shape
    tm = _row_tile(n)
    rows = n // tm

    supports = supports.astype(jnp.float32)
    if featureless:
        pre_sup = weights.astype(jnp.float32)            # (S, N, F)
    else:
        pre_sup = _compute_presup(x.astype(jnp.float32),
                                  weights.astype(jnp.float32), tm)
    f = pre_sup.shape[-1]

    kernel = functools.partial(_aggregate_kernel, apply_relu=apply_relu)

    return pl.pallas_call(
        kernel,
        out_shape=jax.ShapeDtypeStruct((n, f), jnp.float32),
        grid_spec=pltpu.PrefetchScalarGridSpec(
            num_scalar_prefetch=0,
            grid=(rows, s_num),                           # S innermost (reduction)
            in_specs=[
                # support[s] row tile: (TM, N)
                pl.BlockSpec((pl.Squeezed(), tm, n), lambda i, s: (s, i, 0)),
                # pre_sup[s]: full (N, F) block for this support
                pl.BlockSpec((pl.Squeezed(), n, f), lambda i, s: (s, 0, 0)),
            ],
            # resident f32 accumulator block — same index for all s
            out_specs=pl.BlockSpec((tm, f), lambda i, s: (i, 0)),
        ),
        compiler_params=pltpu.CompilerParams(
            dimension_semantics=("parallel", "arbitrary"),
        ),
    )(supports, pre_sup)


if __name__ == "__main__":
    # Small synthetic problem exercising multiple row tiles (rows = N/TM = 2):
    # N=512 nodes, input_dim=32, output_dim=128, two support matrices.
    N, D, F, S = 512, 32, 128, 2

    key = jax.random.PRNGKey(0)
    kx, ks, kw, kf = jax.random.split(key, 4)

    x = jax.random.normal(kx, (N, D), dtype=jnp.float32)
    supports = jax.random.normal(ks, (S, N, N), dtype=jnp.float32)
    weights = jax.random.normal(kw, (S, D, F), dtype=jnp.float32)

    # Pure-JAX reference (same math as the PyTorch forward).
    ref = jnp.zeros((N, F), jnp.float32)
    for i in range(S):
        ref = ref + supports[i] @ (x @ weights[i])

    # --- no activation ---
    out = jax.block_until_ready(graph_convolution(x, supports, weights))
    assert out.shape == (N, F)
    assert jnp.allclose(out, ref, atol=1e-3, rtol=1e-3), "mismatch (linear)"

    # --- ReLU activation ---
    out_relu = jax.block_until_ready(
        graph_convolution(x, supports, weights, apply_relu=True))
    assert jnp.allclose(out_relu, jnp.maximum(ref, 0.0),
                        atol=1e-3, rtol=1e-3), "mismatch (relu)"

    # --- featureless path: pre_sup_i = W_i directly ---
    weights_f = jax.random.normal(kf, (S, N, F), dtype=jnp.float32)
    out_fl = jax.block_until_ready(
        graph_convolution(x, supports, weights_f, featureless=True))
    ref_fl = sum(supports[i] @ weights_f[i] for i in range(S))
    assert jnp.allclose(out_fl, ref_fl, atol=1e-3, rtol=1e-3), "mismatch (featureless)"

    print("KERNEL_OK")
</pallas_src>

<mosaic_0001>
module attributes {stable_mosaic.version = 11 : i64} {
  func.func @_presup_kernel(%arg0: i32, %arg1: i32, %arg2: memref<256x32xf32, #tpu.memory_space<vmem>>, %arg3: memref<1x32x128xf32, #tpu.memory_space<vmem>>, %arg4: memref<1x256x128xf32, #tpu.memory_space<vmem>>) attributes {dimension_semantics = [#tpu.dimension_semantics<parallel>, #tpu.dimension_semantics<parallel>], iteration_bounds = array<i64: 2, 2>, scalar_prefetch = 0 : i64, scratch_operands = 0 : i64, tpu.core_type = #tpu.core_type<tc>, window_params = [{transform_indices = @transform_0, window_bounds = array<i64: 256, 32>}, {transform_indices = @transform_1, window_bounds = array<i64: 1, 32, 128>}, {transform_indices = @transform_2, window_bounds = array<i64: 1, 256, 128>}]} {
    %c0 = arith.constant 0 : index
    %c0_0 = arith.constant 0 : index
    %0 = vector.load %arg2[%c0, %c0_0] : memref<256x32xf32, #tpu.memory_space<vmem>>, vector<256x32xf32>
    %c0_1 = arith.constant 0 : index
    %c0_2 = arith.constant 0 : index
    %c0_3 = arith.constant 0 : index
    %1 = vector.load %arg3[%c0_1, %c0_2, %c0_3] : memref<1x32x128xf32, #tpu.memory_space<vmem>>, vector<1x32x128xf32>
    %2 = vector.shape_cast %1 : vector<1x32x128xf32> to vector<32x128xf32>
    %cst = arith.constant dense<0.000000e+00> : vector<256x128xf32>
    %3 = tpu.matmul %0, %2, %cst {dimension_numbers = #tpu.dot_dimension_numbers<[1], [0], [0], [1], [0, 0, 1, 1], [], []>} : vector<256x32xf32>, vector<32x128xf32>, vector<256x128xf32> -> vector<256x128xf32>
    %c0_4 = arith.constant 0 : index
    %c0_5 = arith.constant 0 : index
    %c0_6 = arith.constant 0 : index
    %4 = vector.load %arg4[%c0_4, %c0_5, %c0_6] : memref<1x256x128xf32, #tpu.memory_space<vmem>>, vector<1x256x128xf32>
    %5 = vector.shape_cast %4 : vector<1x256x128xf32> to vector<256x128xf32>
    %6 = vector.shape_cast %3 : vector<256x128xf32> to vector<1x256x128xf32>
    tpu.vector_store %arg4[%c0_4, %c0_5, %c0_6], %6 {strides = array<i32>} : memref<1x256x128xf32, #tpu.memory_space<vmem>>, vector<1x256x128xf32>,
    return
  }
  func.func @transform_0(%arg0: i32, %arg1: i32) -> (i32, i32) {
    %c0_i32 = arith.constant 0 : i32
    %c0_i32_0 = arith.constant 0 : i32
    return %arg1, %c0_i32 : i32, i32
  }
  func.func @transform_1(%arg0: i32, %arg1: i32) -> (i32, i32, i32) {
    %c0_i32 = arith.constant 0 : i32
    %c0_i32_0 = arith.constant 0 : i32
    %c0_i32_1 = arith.constant 0 : i32
    return %arg0, %c0_i32, %c0_i32_0 : i32, i32, i32
  }
  func.func @transform_2(%arg0: i32, %arg1: i32) -> (i32, i32, i32) {
    %c0_i32 = arith.constant 0 : i32
    %c0_i32_0 = arith.constant 0 : i32
    return %arg0, %arg1, %c0_i32 : i32, i32, i32
  }
}

</mosaic_0001>

<bundles_post_ra>
// kernel: tpu_custom_call.1
= control target key start
LH: loop header
LB: loop body
LE: loop exit
PB: predicated region body
PF: predicated region fallthrough
CT: control target
= control target key end

     0   :  { %7 = vsyncpa [#allocation3], 0  ;;  %s1264_s0 = inlined_call_operand.vmem [shape: f32[512,32], index: 0, kind: input, shape index: {}]   ;;  %s1265_s1 = inlined_call_operand.vmem [shape: f32[2,32,128], index: 1, kind: input, shape index: {}]   ;;  %s1266_s2 = inlined_call_operand.hbm [shape: f32[2,512,128], index: 2, kind: output, shape index: {}]  }
   0x1   :  { %9 = vsyncpa [#allocation3 + $0x1], 0  ;;  %s1013_s9 = smov 0   ;;  %s1015_s10 = smov 0  }
   0x2   :  { %s1017_s11 = smov 0   ;;  %s1019_s12 = smov 0  }
   0x3   :  { %s1021_s13 = smov 0   ;;  %s1023_s14 = smov 0  }
   0x4   :  { %s1025_s15 = smov 0   ;;  %s1027_s16 = smov 0  }
   0x5 LB: > { %s673_s17 = sadd.s32 4294967295, %s993_s16   ;;  %s674_s18 = sadd.s32 4294967294, %s993_s16   ;;  %s993_s16 = sphi %s1027_s16, %s15_s16   ;;  %s989_s15 = sphi %s1025_s15, %s1275_s15   ;;  %s985_s14 = sphi %s1023_s14, %s1274_s14   ;;  %s981_s13 = sphi %s1021_s13, %s1273_s13   ;;  %s977_s12 = sphi %s1019_s12, %s1272_s12   ;;  %s973_s11 = sphi %s1017_s11, %s1271_s11   ;;  %s969_s10 = sphi %s1015_s10, %s1270_s10   ;;  %s965_s9 = sphi %s1013_s9, %s1269_s9  }
   0x6   : > { %s24_s19 = sadd.s32 1, %s985_s14  ;;  %s27_s20 = sadd.s32 1, %s989_s15 }
   0x7   : > { %p25_p0 = scmp.ge.s32.totalorder %s24_s19, 2  ;;  %p98_p1 = scmp.ne.s32.totalorder %s973_s11, %s969_s10 }
   0x8   : > { %p99_p2 = scmp.eq.s32.totalorder %s673_s17, 3  ;;  %p104_p5 = scmp.ne.s32.totalorder %s969_s10, %s965_s9 }
   0x9   : > { %s1277_s19 = smov (%p25_p0, %s24_s19), 0  ;;  %s1279_s20 = smov (!%p25_p0, %s27_s20), %s989_s15 }
   0xa   : > { %s84_s21 = ssub.s32 %s985_s14, %s1277_s19  ;;  %p1064_p3 = por %p99_p2, %p98_p1 }
   0xb   : > { %p29_p4 = scmp.ge.s32.totalorder %s1279_s20, 2  ;;  %p105_p6 = scmp.eq.s32.totalorder %s674_s18, 3 }
   0xc   : > { %p677_p7 = scmp.ge.s32.totalorder %s993_s16, 1  ;;  %p140_p9 = scmp.lt.s32.totalorder %s993_s16, 5 }
   0xd   : > { %s1281_s20 = smov (%p29_p4, %s1279_s20), 0  ;;  %p1073_p8 = por %p105_p6, %p104_p5 }
   0xe   : > { %s83_s24 = ssub.s32 %s989_s15, %s1281_s20  ;;  %s88_s25 = sadd.s32 1, %s973_s11 }
   0xf   : > { %s85_s26 = sor.u32 %s84_s21, %s83_s24  ;;  %p141_p10 = pnand %p677_p7, %p140_p9 }
  0x10   : > { %p86_p11 = scmp.eq.s32.totalorder %s85_s26, 0  ;;  %p173_p12 = scmp.lt.s32.totalorder (!%p141_p10), %s981_s13, 1  ;;  %vm215_vm0 = vcmask (!%p141_p10), 261120  }
  0x11   : > { %144 = sbr.rel (%p141_p10) target bundleno = 296 (0x128), region = 28  ;;  %s1086_s28 = sshll.u32 (!%p141_p10), %s977_s12, 5 }
  0x12   : > { %s1082_s27 = scalar_select %p86_p11, %s973_s11, %s88_s25  }
  0x13   : > { %p168_p13 = scmp.lt.s32.totalorder (!%p141_p10), %s1086_s28, 63  ;;  %s164_s18 = sand.u32 (!%p141_p10), 1, %s969_s10  }
  0x14   : > { %s678_s21 = sshll.u32 (!%p141_p10), %s164_s18, 8  ;;  %s717_s25 = sshll.u32 (!%p141_p10), %s981_s13, 6 }
  0x15   : > { %s1166_s24 = scalar_lea.vmem (!%p141_p10), [#allocation2], %s678_s21  ;;  %s582_s26 = sadd.s32 (!%p141_p10), %s717_s25, %s1086_s28 }
  0x16   : > { %s1212_s4 = scalar_lea.sflag (!%p141_p10), [#allocation3], %s164_s18 }
  0x18   : > { %s174_s29 = scalar_select %p173_p12, %s981_s13, 1 }
  0x19   : > { %s169_s30 = scalar_select %p168_p13, %s1086_s28, 63 }
  0x1a   : > { %s721_s3 = sshll.u32 %s174_s29, 5  ;;  %s718_s13 = sshll.u32 %s582_s26, 7 }
  0x1b   : > { %s177_s6 = scalar_lea.vmem %s1265_s1, %s721_s3  ;;  %s680_s7 = sshll.u32 %s169_s30, 3 }
  0x1c   : > { %v211_v0 = vld [vmem:[%s177_s6] sm:$0xff]  ;;  %v212_v1 = vld [vmem:[%s177_s6 + $0x8] sm:$0xff]  ;;  %v213_v2 = vld [vmem:[%s177_s6 + $0x10] sm:$0xff]  ;;  %s1097_s12 = scalar_lea.vmem %s1264_s0, %s680_s7  ;;  %s585_s29 = sshll.u32 %s1166_s24, 4  ;;  %s1204_s29 = int_to_ptr.vmem [resolvable:$true] %s585_s29 }
  0x1d   : > { %v814_v3 = vpack.c.bf16 %v212_v1, %v211_v0  ;;  %v214_v4 = vld [vmem:[%s177_s6 + $0x18] sm:$0xff]  ;;  %v179_v5 = vld [vmem:[%s1097_s12] sm:$0xff]  ;;  %v180_v8 = vld [vmem:[%s1097_s12 + $0x8] sm:$0xff]  ;;  %s1200_s3 = scalar_lea.hbm %s1266_s2, %s718_s13  ;;  %s899_s5 = scalar_lea.vmem %s1204_s29, 4096 }
  0x1e   : > { %v195_v6 = vld [vmem:[%s1097_s12 + $0x80] sm:$0xff]  ;;  %v818_v7 = vpack.c.bf16 %v214_v4, %v213_v2  ;;  %766 = vmatprep.mubr.msk.f32.mxu0 %vm215_vm0, %v179_v5  ;;  %v196_v9 = vld [vmem:[%s1097_s12 + $0x88] sm:$0xff]  ;;  %v181_v10 = vld [vmem:[%s1097_s12 + $0x10] sm:$0xff]  ;;  %p900_p0 = scmp.ne.s32.totalorder %s1204_s29, %s899_s5  ;;  %s995_s6 = smov [#allocation2]  }
  0x1f   : > { %790 = vmatprep.mubr.msk.f32.mxu1 %vm215_vm0, %v195_v6  ;;  %815 = vmatprep.subr.bf16.mxu0 %v814_v3  ;;  %v197_v11 = vld [vmem:[%s1097_s12 + $0x90] sm:$0xff]  ;;  %v182_v12 = vld [vmem:[%s1097_s12 + $0x18] sm:$0xff]  ;;  %v183_v14 = vld [vmem:[%s1097_s12 + $0x20] sm:$0xff]  ;;  %s903_s7 = sshll.u32 %s995_s6, 4  ;;  %s904_s7 = int_to_ptr.vmem [resolvable:$false] %s903_s7 }
  0x20   : > { %822 = vmatprep.subr.bf16.mxu1 %v814_v3  ;;  %817 = vmatpush3.bf16.msra.mxu0 %v814_v3  ;;  %v198_v13 = vld [vmem:[%s1097_s12 + $0x98] sm:$0xff]  ;;  %v199_v15 = vld [vmem:[%s1097_s12 + $0xa0] sm:$0xff]  ;;  %v184_v16 = vld [vmem:[%s1097_s12 + $0x28] sm:$0xff]  ;;  %p901_p1 = pnand %p900_p0, %p1064_p3  ;;  %s905_s8 = scalar_lea.vmem %s904_s7, 8192 }
  0x21   : > { %824 = vmatpush3.bf16.msra.mxu1 %v814_v3  ;;  %819 = vmatprep.subr.bf16.mxu0 %v818_v7  ;;  %v200_v17 = vld [vmem:[%s1097_s12 + $0xa8] sm:$0xff]  ;;  %v185_v18 = vld [vmem:[%s1097_s12 + $0x30] sm:$0xff]  ;;  %v186_v20 = vld [vmem:[%s1097_s12 + $0x38] sm:$0xff]  ;;  %p906_p4 = scmp.lt.s32.totalorder %s1204_s29, %s904_s7  ;;  %p907_p5 = scmp.lt.s32.totalorder %s905_s8, %s899_s5 }
  0x22   : > { %823 = vmatprep.subr.bf16.mxu1 %v818_v7  ;;  %v201_v19 = vld [vmem:[%s1097_s12 + $0xb0] sm:$0xff]  ;;  %v202_v21 = vld [vmem:[%s1097_s12 + $0xb8] sm:$0xff]  ;;  %v187_v22 = vld [vmem:[%s1097_s12 + $0x40] sm:$0xff]  ;;  %p902_p2 = pneg %p901_p1 }
  0x23   : > { %v203_v23 = vld [vmem:[%s1097_s12 + $0xc0] sm:$0xff]  ;;  %v188_v24 = vld [vmem:[%s1097_s12 + $0x48] sm:$0xff]  ;;  %v189_v26 = vld [vmem:[%s1097_s12 + $0x50] sm:$0xff]  ;;  %p908_p6 = por %p907_p5, %p906_p4 }
  0x24   : > { %821 = vmatpush3.bf16.msra.mxu0 %v818_v7  ;;  %v204_v25 = vld [vmem:[%s1097_s12 + $0xc8] sm:$0xff]  ;;  %v205_v27 = vld [vmem:[%s1097_s12 + $0xd0] sm:$0xff]  ;;  %v190_v28 = vld [vmem:[%s1097_s12 + $0x58] sm:$0xff] }
  0x25   : > { %825 = vmatpush3.bf16.msra.mxu1 %v818_v7  ;;  %v206_v29 = vld [vmem:[%s1097_s12 + $0xd8] sm:$0xff]  ;;  %v191_v30 = vld [vmem:[%s1097_s12 + $0x60] sm:$0xff]  ;;  %v192_v32 = vld [vmem:[%s1097_s12 + $0x68] sm:$0xff]  ;;  %p909_p7 = pnand %p908_p6, %p902_p2 }
  0x26   : > { %v207_v31 = vld [vmem:[%s1097_s12 + $0xe0] sm:$0xff]  ;;  %v208_v33 = vld [vmem:[%s1097_s12 + $0xe8] sm:$0xff]  ;;  %v193_v34 = vld [vmem:[%s1097_s12 + $0x70] sm:$0xff] }
  0x27   : > { %767 = vmatmul.mubr.msk.f32.vlgmr.msra.gmra.mrb[0].mxu0 %vm215_vm0, %v180_v8  ;;  %v209_v35 = vld [vmem:[%s1097_s12 + $0xf0] sm:$0xff]  ;;  %v194_v36 = vld [vmem:[%s1097_s12 + $0x78] sm:$0xff] }
  0x28   : > { %791 = vmatmul.mubr.msk.f32.vlgmr.msra.gmra.mrb[0].mxu1 %vm215_vm0, %v196_v9  ;;  %769 = vmatprep.mubr.msk.f32.mxu0 %vm215_vm0, %v181_v10  ;;  %v210_v37 = vld [vmem:[%s1097_s12 + $0xf8] sm:$0xff] }
  0x29   : > { %793 = vmatprep.mubr.msk.f32.mxu1 %vm215_vm0, %v197_v11 }
  0x2b   : > { %770 = vmatmul.mubr.msk.f32.gmra.mrb[2].mxu0 %vm215_vm0, %v182_v12 }
  0x2c   : > { %794 = vmatmul.mubr.msk.f32.gmra.mrb[2].mxu1 %vm215_vm0, %v198_v13  ;;  %772 = vmatprep.mubr.msk.f32.mxu0 %vm215_vm0, %v183_v14 }
  0x2d   : > { %796 = vmatprep.mubr.msk.f32.mxu1 %vm215_vm0, %v199_v15 }
  0x2f   : > { %773 = vmatmul.mubr.msk.f32.gmra.mrb[4].mxu0 %vm215_vm0, %v184_v16 }
  0x30   : > { %797 = vmatmul.mubr.msk.f32.gmra.mrb[4].mxu1 %vm215_vm0, %v200_v17  ;;  %775 = vmatprep.mubr.msk.f32.mxu0 %vm215_vm0, %v185_v18 }
  0x31   : > { %799 = vmatprep.mubr.msk.f32.mxu1 %vm215_vm0, %v201_v19 }
  0x33   : > { %776 = vmatmul.mubr.msk.f32.gmra.mrb[6].mxu0 %vm215_vm0, %v186_v20 }
  0x34   : > { %800 = vmatmul.mubr.msk.f32.gmra.mrb[6].mxu1 %vm215_vm0, %v202_v21  ;;  %778 = vmatprep.mubr.msk.f32.mxu0 %vm215_vm0, %v187_v22 }
  0x35   : > { %802 = vmatprep.mubr.msk.f32.mxu1 %vm215_vm0, %v203_v23 }
  0x37   : > { %779 = vmatmul.mubr.msk.f32.gmra.mrb[8].mxu0 %vm215_vm0, %v188_v24 }
  0x38   : > { %803 = vmatmul.mubr.msk.f32.gmra.mrb[8].mxu1 %vm215_vm0, %v204_v25  ;;  %781 = vmatprep.mubr.msk.f32.mxu0 %vm215_vm0, %v189_v26 }
  0x39   : > { %805 = vmatprep.mubr.msk.f32.mxu1 %vm215_vm0, %v205_v27 }
  0x3b   : > { %782 = vmatmul.mubr.msk.f32.gmra.mrb[10].mxu0 %vm215_vm0, %v190_v28 }
  0x3c   : > { %806 = vmatmul.mubr.msk.f32.gmra.mrb[10].mxu1 %vm215_vm0, %v206_v29  ;;  %784 = vmatprep.mubr.msk.f32.mxu0 %vm215_vm0, %v191_v30 }
  0x3d   : > { %808 = vmatprep.mubr.msk.f32.mxu1 %vm215_vm0, %v207_v31 }
  0x3f   : > { %785 = vmatmul.mubr.msk.f32.gmra.mrb[12].mxu0 %vm215_vm0, %v192_v32 }
  0x40   : > { %809 = vmatmul.mubr.msk.f32.gmra.mrb[12].mxu1 %vm215_vm0, %v208_v33  ;;  %787 = vmatprep.mubr.msk.f32.mxu0 %vm215_vm0, %v193_v34 }
  0x41   : > { %811 = vmatprep.mubr.msk.f32.mxu1 %vm215_vm0, %v209_v35 }
  0x43   : > { %788 = vmatmul.mubr.msk.f32.gmra.mrb[14].mxu0 %vm215_vm0, %v194_v36 }
  0x44   : > { %812 = vmatmul.mubr.msk.f32.gmra.mrb[14].mxu1 %vm215_vm0, %v210_v37 }
  0xfa   : > { %v768_v38 = vpop.f32.mrb[0].mxu0 }
  0xfb   : > { %v792_v39 = vpop.f32.mrb[0].mxu1  ;;  %538 = vst [vmem:[%s1166_s24 + $0x8] sm:$0xff] %v768_v38  ;;  %v378_v40 = vpop.f32.mrb[1].mxu0 }
  0xfc   : > { %554 = vst [vmem:[%s1166_s24 + $0x88] sm:$0xff] %v792_v39  ;;  %v458_v41 = vpop.f32.mrb[1].mxu1  ;;  %537 = vst [vmem:[%s1166_s24] sm:$0xff] %v378_v40 }
  0xfd   : > { %553 = vst [vmem:[%s1166_s24 + $0x80] sm:$0xff] %v458_v41 }
  0xfe   : > { %v771_v42 = vpop.f32.mrb[2].mxu0 }
  0xff   : > { %v795_v43 = vpop.f32.mrb[2].mxu1  ;;  %540 = vst [vmem:[%s1166_s24 + $0x18] sm:$0xff] %v771_v42  ;;  %v388_v44 = vpop.f32.mrb[3].mxu0 }
 0x100   : > { %556 = vst [vmem:[%s1166_s24 + $0x98] sm:$0xff] %v795_v43  ;;  %v468_v45 = vpop.f32.mrb[3].mxu1  ;;  %539 = vst [vmem:[%s1166_s24 + $0x10] sm:$0xff] %v388_v44 }
 0x101   : > { %555 = vst [vmem:[%s1166_s24 + $0x90] sm:$0xff] %v468_v45 }
 0x102   : > { %v774_v46 = vpop.f32.mrb[4].mxu0 }
 0x103   : > { %v798_v47 = vpop.f32.mrb[4].mxu1  ;;  %542 = vst [vmem:[%s1166_s24 + $0x28] sm:$0xff] %v774_v46  ;;  %v398_v48 = vpop.f32.mrb[5].mxu0 }
 0x104   : > { %558 = vst [vmem:[%s1166_s24 + $0xa8] sm:$0xff] %v798_v47  ;;  %v478_v49 = vpop.f32.mrb[5].mxu1  ;;  %541 = vst [vmem:[%s1166_s24 + $0x20] sm:$0xff] %v398_v48 }
 0x105   : > { %557 = vst [vmem:[%s1166_s24 + $0xa0] sm:$0xff] %v478_v49 }
 0x106   : > { %v777_v50 = vpop.f32.mrb[6].mxu0 }
 0x107   : > { %v801_v51 = vpop.f32.mrb[6].mxu1  ;;  %544 = vst [vmem:[%s1166_s24 + $0x38] sm:$0xff] %v777_v50  ;;  %v408_v52 = vpop.f32.mrb[7].mxu0 }
 0x108   : > { %560 = vst [vmem:[%s1166_s24 + $0xb8] sm:$0xff] %v801_v51  ;;  %v488_v53 = vpop.f32.mrb[7].mxu1  ;;  %543 = vst [vmem:[%s1166_s24 + $0x30] sm:$0xff] %v408_v52 }
 0x109   : > { %559 = vst [vmem:[%s1166_s24 + $0xb0] sm:$0xff] %v488_v53 }
 0x10a   : > { %v780_v54 = vpop.f32.mrb[8].mxu0 }
 0x10b   : > { %v804_v55 = vpop.f32.mrb[8].mxu1  ;;  %546 = vst [vmem:[%s1166_s24 + $0x48] sm:$0xff] %v780_v54  ;;  %v418_v56 = vpop.f32.mrb[9].mxu0 }
 0x10c   : > { %562 = vst [vmem:[%s1166_s24 + $0xc8] sm:$0xff] %v804_v55  ;;  %v498_v57 = vpop.f32.mrb[9].mxu1  ;;  %545 = vst [vmem:[%s1166_s24 + $0x40] sm:$0xff] %v418_v56 }
 0x10d   : > { %561 = vst [vmem:[%s1166_s24 + $0xc0] sm:$0xff] %v498_v57 }
 0x10e   : > { %v783_v58 = vpop.f32.mrb[10].mxu0 }
 0x10f   : > { %v807_v59 = vpop.f32.mrb[10].mxu1  ;;  %548 = vst [vmem:[%s1166_s24 + $0x58] sm:$0xff] %v783_v58  ;;  %v428_v60 = vpop.f32.mrb[11].mxu0 }
 0x110   : > { %564 = vst [vmem:[%s1166_s24 + $0xd8] sm:$0xff] %v807_v59  ;;  %v508_v61 = vpop.f32.mrb[11].mxu1  ;;  %547 = vst [vmem:[%s1166_s24 + $0x50] sm:$0xff] %v428_v60 }
 0x111   : > { %563 = vst [vmem:[%s1166_s24 + $0xd0] sm:$0xff] %v508_v61 }
 0x112   : > { %v786_v62 = vpop.f32.mrb[12].mxu0 }
 0x113   : > { %v810_v63 = vpop.f32.mrb[12].mxu1  ;;  %550 = vst [vmem:[%s1166_s24 + $0x68] sm:$0xff] %v786_v62  ;;  %v438_v0 = vpop.f32.mrb[13].mxu0 }
 0x114   : > { %566 = vst [vmem:[%s1166_s24 + $0xe8] sm:$0xff] %v810_v63  ;;  %v518_v1 = vpop.f32.mrb[13].mxu1  ;;  %549 = vst [vmem:[%s1166_s24 + $0x60] sm:$0xff] %v438_v0 }
 0x115   : > { %565 = vst [vmem:[%s1166_s24 + $0xe0] sm:$0xff] %v518_v1 }
 0x116   : > { %v789_v2 = vpop.f32.mrb[14].mxu0 }
 0x117   : > { %v813_v3 = vpop.f32.mrb[14].mxu1  ;;  %552 = vst [vmem:[%s1166_s24 + $0x78] sm:$0xff] %v789_v2  ;;  %v448_v4 = vpop.f32.mrb[15].mxu0 }
 0x118   : > { %568 = vst [vmem:[%s1166_s24 + $0xf8] sm:$0xff] %v813_v3  ;;  %v528_v5 = vpop.f32.mrb[15].mxu1  ;;  %551 = vst [vmem:[%s1166_s24 + $0x70] sm:$0xff] %v448_v4 }
 0x119   : > { %567 = vst [vmem:[%s1166_s24 + $0xf0] sm:$0xff] %v528_v5 }
 0x11a   : > { %912 = shalt.err (!%p909_p7)
}
 0x11b   : > { %s913_s17 = scalar_lea.hbm %s1200_s3, 4096  ;;  %s917_s21 = scalar_lea.hbm %s1266_s2, 16384 }
 0x11c   : > { %p914_p9 = scmp.ne.s32.totalorder %s1200_s3, %s913_s17  ;;  %p918_p12 = scmp.lt.u32.totalorder %s1200_s3, %s1266_s2 }
 0x11d   : > { %p919_p13 = scmp.lt.u32.totalorder %s917_s21, %s913_s17  ;;  %p921_p1 = scmp.lt.u32.totalorder %s913_s17, %s1200_s3 }
 0x11e   : > { %p915_p10 = pnand %p914_p9, %p1064_p3 }
 0x11f   : > { %p920_p0 = por %p919_p13, %p918_p12 }
 0x120   : > { %p916_p11 = pneg %p915_p10 }
 0x121   : > { %p922_p2 = por %p921_p1, %p920_p0 }
 0x123   : > { %p923_p4 = pnand %p922_p2, %p916_p11 }
 0x125   : > { %926 = shalt.err (!%p923_p4)
}
 0x126   : > { %s996_s26 = smov 128   ;;  %s997_s13 = smov 8  }
 0x127   : > { %826 = dma.vmem_to_hbm [thread:$0]  (%p1064_p3), %s1204_s29, 4096, %s1200_s3, %s1212_s4, %s996_s26, %s996_s26, %s997_s13  }
 0x128 PF: > { %p832_p5 = scmp.ge.s32.totalorder %s993_s16, 2  ;;  %s600_s28 = sand.u32 1, %s965_s9  }
 0x129   : > { %s601_s30 = scalar_lea.sflag [#allocation3], %s600_s28 }
 0x12a   : > { %p829_p6 = pnand %p832_p5, %p1073_p8 }
 0x12c   : > { %960 = dma.done.wait (!%p829_p6), %s601_s30, 4096  }
 0x12d   : > { %962 = vsyncadd (!%p829_p6), %s601_s30, 4294963200  ;;  %s15_s16 = sadd.s32 1, %s993_s16   ;;  %s1269_s9 = smov %s969_s10 }
 0x12e   : > { %p12_p7 = scmp.ge.s32.totalorder %s15_s16, 6   ;;  %s1270_s10 = smov %s973_s11 }
 0x12f   : > { %s1271_s11 = smov %s1082_s27  ;;  %s1272_s12 = smov %s985_s14 }
 0x130   : > { %s1273_s13 = smov %s989_s15  ;;  %s1274_s14 = smov %s1277_s19 }
 0x131   : > { %s1275_s15 = smov %s1281_s20  ;;  %14 = sbr.rel (!%p12_p7) target bundleno = 5 (0x5), region = 66 }
 0x138   :  { %606 = vsyncpa [#allocation3], 1 }
 0x139   :  { %608 = vsyncpa [#allocation3 + $0x1], 1 }

</bundles_post_ra>
